<compile_context>
chip_gen: v5e
topology: v5e:2x2
jax: 0.10.0
libtpu: 0.0.40
codegen_flags: <defaults>
</compile_context>

<pallas_src>
import functools

import jax
import jax.numpy as jnp
import numpy as np
from jax import lax
from jax.experimental import pallas as pl
from jax.experimental.pallas import tpu as pltpu

_VMEM_LIMIT_BYTES = 32 * 1024 * 1024   # safe on v5e/v6e (128 MiB) and v7x (64 MiB)


def _pick_tile(n, bytes_per_item, target_bytes):
    """Largest tile (in items) worth <= target_bytes that evenly divides n."""
    t = max(1, min(n, target_bytes // max(int(bytes_per_item), 1)))
    while n % t:
        t -= 1
    return t


# ----------------------------- avg extraction ------------------------------ #
def _avg_kernel(v_ref, o_ref):
    # v_ref: (tv, F, D) block of videos; o_ref: (tv, D)
    inv_f = jnp.float32(1.0 / v_ref.shape[1])
    acc = jnp.sum(v_ref[...].astype(jnp.float32), axis=1)   # f32 accumulate
    o_ref[...] = (acc * inv_f).astype(o_ref.dtype)


def avg_extraction(text_embeds, video_embeds, *, target_block_bytes=2 << 20):
    del text_embeds  # unused, matches torch signature
    V, F, D = video_embeds.shape
    tv = _pick_tile(V, F * D * video_embeds.dtype.itemsize, target_block_bytes)
    return pl.pallas_call(
        _avg_kernel,
        out_shape=jax.ShapeDtypeStruct((V, D), video_embeds.dtype),
        grid=(V // tv,),
        in_specs=[pl.BlockSpec((tv, F, D), lambda i: (i, 0, 0))],
        out_specs=pl.BlockSpec((tv, D), lambda i: (i, 0)),
        compiler_params=pltpu.CompilerParams(
            dimension_semantics=("parallel",),
            vmem_limit_bytes=_VMEM_LIMIT_BYTES),
    )(video_embeds)


# ----------------------------- topk extraction ----------------------------- #
def _topk_kernel(t_ref, v_ref, pooled_ref, idx_ref, *, k):
    # t_ref:      (T, D)     full text embeddings (native dtype)
    # v_ref:      (B, F, D)  batch of B videos for this grid step
    # pooled_ref: (B, T, D)  sum of the k selected frames per (video, text)
    # idx_ref:    (B, T, k)  selected frame indices (swapped to (k, T) outside)
    v = v_ref[...]                                   # native dtype for the MXU
    B, F, D = v.shape
    T = t_ref.shape[0]

    # Broadcast text once per grid step; batched MXU matmul with frames on the
    # lane axis -> (B, T, F) f32 similarities.
    t_b = jnp.broadcast_to(t_ref[...][None], (B, T, D))
    sims = jnp.einsum('btd,bfd->btf', t_b, v,
                      preferred_element_type=jnp.float32)

    col_ids = lax.broadcasted_iota(jnp.int32, (B, T, F), 2)
    selected = jnp.zeros((B, T, F), jnp.float32)     # 0/1 selection matrix
    sims_cur = sims
    idx_cols = []
    for _ in range(k):                               # k small & static -> unrolled
        max_vals = jnp.max(sims_cur, axis=-1, keepdims=True)          # (B, T, 1)
        is_max = sims_cur == max_vals
        # first-occurrence argmax (matches lax.top_k / torch tie-breaking)
        idx = jnp.min(jnp.where(is_max, col_ids, F), axis=-1,
                      keepdims=True)                                  # (B, T, 1)
        onehot = col_ids == idx                                       # shared mask
        idx_cols.append(idx)
        selected = selected + onehot.astype(jnp.float32)
        sims_cur = jnp.where(onehot, -jnp.inf, sims_cur)

    # Single contiguous store for the whole (B, T, k) index block.
    idx_ref[...] = jnp.concatenate(idx_cols, axis=-1).astype(jnp.int32)

    # Gather + sum of the k selected frames == selected @ frames (batched MXU);
    # selection entries are exactly 0/1 so the native-dtype cast is lossless.
    pooled = jnp.einsum('btf,bfd->btd', selected.astype(v.dtype), v,
                        preferred_element_type=jnp.float32)           # (B, T, D)
    pooled_ref[...] = pooled.astype(pooled_ref.dtype)


def topk_extraction(text_embeds, video_embeds, k, *, target_block_bytes=4 << 20):
    V, F, D = video_embeds.shape
    T, D2 = text_embeds.shape
    assert D == D2
    assert 0 < k <= F

    it_v = video_embeds.dtype.itemsize
    it_t = text_embeds.dtype.itemsize
    # Per-video VMEM working set: frames block + f32 sims/selection/iota +
    # broadcast text + pooled (f32 + native) + indices.
    per_video = (F * D * it_v
                 + 3 * T * F * 4
                 + T * D * it_t
                 + T * D * (4 + it_v)
                 + T * k * 4)
    vb = _pick_tile(V, per_video, target_block_bytes)

    pooled, idx_tk = pl.pallas_call(
        functools.partial(_topk_kernel, k=k),
        out_shape=(
            jax.ShapeDtypeStruct((V, T, D), video_embeds.dtype),
            jax.ShapeDtypeStruct((V, T, k), jnp.int32),
        ),
        grid=(V // vb,),
        in_specs=[
            pl.BlockSpec((T, D), lambda i: (0, 0)),          # text: replicated
            pl.BlockSpec((vb, F, D), lambda i: (i, 0, 0)),   # vb videos / step
        ],
        out_specs=(
            pl.BlockSpec((vb, T, D), lambda i: (i, 0, 0)),
            pl.BlockSpec((vb, T, k), lambda i: (i, 0, 0)),
        ),
        compiler_params=pltpu.CompilerParams(
            dimension_semantics=("parallel",),
            vmem_limit_bytes=_VMEM_LIMIT_BYTES),
    )(text_embeds, video_embeds)

    idx = jnp.swapaxes(idx_tk, 1, 2)     # (V, k, T), matches torch.topk(...)[1]
    return pooled, idx


def expand_topk_indices(idx, embed_dim):
    """Torch-style expanded index tensor (V, k, D, T).

    Kept outside the kernel so the V*k*D*T int32 duplication is only paid if a
    downstream consumer actually needs it."""
    V, k, T = idx.shape
    return jnp.broadcast_to(idx[:, :, None, :], (V, k, embed_dim, T))


# --------------------------- module-style wrapper --------------------------- #
class ExtractKeyframes:
    """Mirrors the PyTorch ExtractKeyframes forward pass."""

    def __init__(self, extract_type, k=None):
        assert extract_type is not None
        if extract_type == 'avg':
            self._fn = self._avg
        elif extract_type == 'topk':
            assert k is not None and k > 0
            self.k = int(k)
            self._fn = self._topk
        else:
            raise NotImplementedError

    def _avg(self, text_embeds, video_embeds):
        return avg_extraction(text_embeds, video_embeds)

    def _topk(self, text_embeds, video_embeds):
        pooled, idx = topk_extraction(text_embeds, video_embeds, self.k)
        # torch returns (pooled.permute(0,2,1) -> (V,T,D), expanded indices (V,k,D,T))
        return pooled, expand_topk_indices(idx, video_embeds.shape[-1])

    def __call__(self, text_embeds, video_embeds):
        return self._fn(text_embeds, video_embeds)


# -------------------------------- reference -------------------------------- #
def _topk_reference(text_embeds, video_embeds, k):
    V, F, D = video_embeds.shape
    sims = jnp.einsum('vfd,td->vft', video_embeds, text_embeds)      # (V, F, T)
    _, idx = lax.top_k(jnp.swapaxes(sims, 1, 2), k)                  # (V, T, k)
    idx = jnp.swapaxes(idx, 1, 2)                                    # (V, k, T)
    gathered = video_embeds[jnp.arange(V)[:, None, None], idx, :]    # (V, k, T, D)
    return gathered.sum(axis=1), idx                                 # (V, T, D)


if __name__ == "__main__":
    # small deterministic shapes
    num_vids, num_frames, embed_dim, num_texts, K = 4, 16, 32, 8, 3

    key = jax.random.PRNGKey(0)
    k_text, k_vid = jax.random.split(key)
    text_embeds = jax.random.normal(k_text, (num_texts, embed_dim), jnp.float32)
    video_embeds = jax.random.normal(k_vid, (num_vids, num_frames, embed_dim),
                                     jnp.float32)

    # --- avg mode ---
    avg_module = ExtractKeyframes('avg')
    pooled_avg = jax.block_until_ready(avg_module(text_embeds, video_embeds))
    np.testing.assert_allclose(np.asarray(pooled_avg),
                               np.asarray(video_embeds.mean(axis=1)),
                               rtol=1e-5, atol=1e-5)

    # --- topk mode ---
    topk_module = ExtractKeyframes('topk', k=K)
    pooled_topk, sims_topk = topk_module(text_embeds, video_embeds)
    pooled_topk = jax.block_until_ready(pooled_topk)
    sims_topk = jax.block_until_ready(sims_topk)
    assert pooled_topk.shape == (num_vids, num_texts, embed_dim)
    assert sims_topk.shape == (num_vids, K, embed_dim, num_texts)

    ref_pooled, ref_idx = _topk_reference(text_embeds, video_embeds, K)
    np.testing.assert_allclose(np.asarray(pooled_topk), np.asarray(ref_pooled),
                               rtol=1e-3, atol=1e-3)
    np.testing.assert_array_equal(
        np.asarray(sims_topk),
        np.asarray(expand_topk_indices(ref_idx, embed_dim)))

    print("KERNEL_OK")
</pallas_src>

<mosaic_0001>
module attributes {stable_mosaic.version = 11 : i64} {
  func.func @_avg_kernel(%arg0: i32, %arg1: memref<4x16x32xf32, #tpu.memory_space<vmem>>, %arg2: memref<4x32xf32, #tpu.memory_space<vmem>>) attributes {dimension_semantics = [#tpu.dimension_semantics<parallel>], iteration_bounds = array<i64: 1>, scalar_prefetch = 0 : i64, scratch_operands = 0 : i64, tpu.core_type = #tpu.core_type<tc>, window_params = [{transform_indices = @transform_0, window_bounds = array<i64: 4, 16, 32>}, {transform_indices = @transform_1, window_bounds = array<i64: 4, 32>}]} {
    %c0 = arith.constant 0 : index
    %c0_0 = arith.constant 0 : index
    %c0_1 = arith.constant 0 : index
    %0 = vector.load %arg1[%c0, %c0_0, %c0_1] : memref<4x16x32xf32, #tpu.memory_space<vmem>>, vector<4x16x32xf32>
    %cst = arith.constant dense<0.000000e+00> : vector<4x32xf32>
    %1 = vector.multi_reduction <add>, %0, %cst [1] : vector<4x16x32xf32> to vector<4x32xf32>
    %cst_2 = arith.constant 6.250000e-02 : f32
    %2 = vector.broadcast %cst_2 : f32 to vector<4x32xf32>
    %3 = arith.mulf %1, %2 : vector<4x32xf32>
    %c0_3 = arith.constant 0 : index
    %c0_4 = arith.constant 0 : index
    %4 = vector.load %arg2[%c0_3, %c0_4] : memref<4x32xf32, #tpu.memory_space<vmem>>, vector<4x32xf32>
    tpu.vector_store %arg2[%c0_3, %c0_4], %3 {strides = array<i32>} : memref<4x32xf32, #tpu.memory_space<vmem>>, vector<4x32xf32>,
    return
  }
  func.func @transform_0(%arg0: i32) -> (i32, i32, i32) {
    %c0_i32 = arith.constant 0 : i32
    %c0_i32_0 = arith.constant 0 : i32
    %c0_i32_1 = arith.constant 0 : i32
    return %arg0, %c0_i32, %c0_i32_0 : i32, i32, i32
  }
  func.func @transform_1(%arg0: i32) -> (i32, i32) {
    %c0_i32 = arith.constant 0 : i32
    %c0_i32_0 = arith.constant 0 : i32
    return %arg0, %c0_i32 : i32, i32
  }
}

</mosaic_0001>

<bundles_post_ra>
// kernel: tpu_custom_call.1
= control target key start
LH: loop header
LB: loop body
LE: loop exit
PB: predicated region body
PF: predicated region fallthrough
CT: control target
= control target key end

     0   :  { %6 = vsyncpa [#allocation3], 0  ;;  %s188_s0 = inlined_call_operand.hbm [shape: f32[4,16,32], index: 0, kind: input, shape index: {}]   ;;  %s189_s1 = inlined_call_operand.hbm [shape: f32[4,32], index: 1, kind: output, shape index: {}]  }
   0x1   :  { %7 = vsyncpa [#allocation4], 0  ;;  %s12_s8 = sshll.u32 %s188_s0, 4  ;;  %s160_s9 = smov [#allocation2]   ;;  %s13_s8 = int_to_ptr.hbm [resolvable:$true] %s12_s8 }
   0x2   :  { %s14_s10 = sshll.u32 %s160_s9, 4  ;;  %s161_s11 = smov 128   ;;  %s15_s10 = int_to_ptr.vmem [resolvable:$true] %s14_s10 }
   0x3   :  { %s162_s12 = smov 8  }
   0x4   :  { %20 = dma.hbm_to_vmem [thread:$0]  %s13_s8, 1024, %s15_s10, [#allocation3], %s161_s11, %s161_s11, %s162_s12  }
   0x5   :  { %156 = dma.done.wait [#allocation3], 1024  }
   0x6   :  { %157 = vsyncadd [#allocation3], 4294966272  ;;  %vm33_vm0 = vcmask 261120   ;;  %v25_v0 = vld [vmem:[#allocation2] sm:$0xff]  ;;  %v26_v1 = vld [vmem:[#allocation2 + $0x8] sm:$0xff]  ;;  %vm78_vm1 = vcmask 1041409  }
   0x7   :  { %v27_v2 = vld [vmem:[#allocation2 + $0x10] sm:$0xff]  ;;  %v28_v3 = vld [vmem:[#allocation2 + $0x18] sm:$0xff]  ;;  %v29_v4 = vld [vmem:[#allocation2 + $0x20] sm:$0xff]  ;;  %v34_v6 = vsel %vm33_vm0, %v25_v0, 0.0  ;;  %v35_v7 = vsel %vm33_vm0, %v26_v1, 0.0  ;;  %vm80_vm2 = vcmask 1042434  }
   0x8   :  { %v30_v5 = vld [vmem:[#allocation2 + $0x28] sm:$0xff]  ;;  %v43_v8 = vsel %vm33_vm0, %v27_v2, 0.0  ;;  %v31_v9 = vld [vmem:[#allocation2 + $0x30] sm:$0xff]  ;;  %v32_v10 = vld [vmem:[#allocation2 + $0x38] sm:$0xff]  ;;  %v36_v11 = vadd.f32 %v35_v7, %v34_v6  ;;  %v44_v12 = vsel %vm33_vm0, %v28_v3, 0.0  ;;  %v52_v13 = vsel %vm33_vm0, %v29_v4, 0.0 }
   0x9   :  { %v53_v14 = vsel %vm33_vm0, %v30_v5, 0.0  ;;  %v45_v15 = vadd.f32 %v44_v12, %v43_v8  ;;  %v61_v17 = vsel %vm33_vm0, %v31_v9, 0.0  ;;  %v62_v18 = vsel %vm33_vm0, %v32_v10, 0.0  ;;  %s163_s0 = smov [#allocation5]   ;;  %s94_s16 = sshll.u32 %s189_s1, 4  ;;  %s95_s16 = int_to_ptr.hbm [resolvable:$true] %s94_s16 }
   0xa   :  { %v54_v16 = vadd.f32 %v53_v14, %v52_v13  ;;  %v37_v19 = vrot.slane %v36_v11, 4  ;;  %v63_v20 = vadd.f32 %v62_v18, %v61_v17  ;;  %s92_s13 = sshll.u32 %s163_s0, 4  ;;  %vm82_vm3 = vcmask 1043459   ;;  %s93_s13 = int_to_ptr.vmem [resolvable:$true] %s92_s13 }
   0xb   :  { %v46_v21 = vrot.slane %v45_v15, 4  ;;  %vm85_vm4 = vcmask 257024  }
   0xc   :  { %v55_v22 = vrot.slane %v54_v16, 4  ;;  %v38_v23 = vadd.f32 %v37_v19, %v36_v11  ;;  %v64_v24 = vrot.slane %v63_v20, 4 }
   0xd   :  { %v47_v25 = vadd.f32 %v46_v21, %v45_v15 }
   0xe   :  { %v56_v26 = vadd.f32 %v55_v22, %v54_v16  ;;  %v39_v27 = vrot.slane %v38_v23, 2  ;;  %v65_v28 = vadd.f32 %v64_v24, %v63_v20 }
   0xf   :  { %v48_v29 = vrot.slane %v47_v25, 2 }
  0x10   :  { %v57_v30 = vrot.slane %v56_v26, 2  ;;  %v40_v31 = vadd.f32 %v39_v27, %v38_v23  ;;  %v66_v32 = vrot.slane %v65_v28, 2 }
  0x11   :  { %v49_v33 = vadd.f32 %v48_v29, %v47_v25 }
  0x12   :  { %v58_v34 = vadd.f32 %v57_v30, %v56_v26  ;;  %v41_v35 = vrot.slane %v40_v31, 1  ;;  %v67_v36 = vadd.f32 %v66_v32, %v65_v28 }
  0x13   :  { %v50_v37 = vrot.slane %v49_v33, 1 }
  0x14   :  { %v59_v38 = vrot.slane %v58_v34, 1  ;;  %v42_v39 = vadd.f32 %v41_v35, %v40_v31  ;;  %v68_v40 = vrot.slane %v67_v36, 1 }
  0x15   :  { %v51_v41 = vadd.f32 %v50_v37, %v49_v33 }
  0x16   :  { %v60_v42 = vadd.f32 %v59_v38, %v58_v34  ;;  %v69_v43 = vadd.f32 %v68_v40, %v67_v36  ;;  %v70_v44 = vmul.f32 0.0625, %v42_v39 }
  0x17   :  { %v71_v45 = vmul.f32 0.0625, %v51_v41 }
  0x18   :  { %v72_v46 = vmul.f32 0.0625, %v60_v42  ;;  %v73_v47 = vmul.f32 0.0625, %v69_v43 }
  0x19   :  { %v79_v48 = vsel %vm78_vm1, %v71_v45, %v70_v44 }
  0x1a   :  { %v81_v49 = vsel %vm80_vm2, %v72_v46, %v79_v48 }
  0x1b   :  { %v83_v50 = vsel %vm82_vm3, %v73_v47, %v81_v49 }
  0x1c   :  { %86 = vst.msk [vmem:[#allocation5] sm:$0xf] %vm85_vm4, %v83_v50 }
  0x1d   :  { %97 = dma.vmem_to_hbm [thread:$0]  %s93_s13, 64, %s95_s16, [#allocation4]  }
  0x1e   :  { %158 = dma.done.wait [#allocation4], 64  }
  0x1f   :  { %159 = vsyncadd [#allocation4], 4294967232 }
  0x20   :  { %102 = vsyncpa [#allocation3], 1 }
  0x21   :  { %103 = vsyncpa [#allocation4], 1 }

</bundles_post_ra>
